<compile_context>
chip_gen: v6e
topology: v6e:2x2x1
jax: 0.10.0
libtpu: 0.0.40
codegen_flags: <defaults>
</compile_context>

<pallas_src>
import jax
import jax.numpy as jnp
from jax import lax
from jax.experimental import pallas as pl
from jax.experimental.pallas import tpu as pltpu


def _round_up(n, m):
    return ((n + m - 1) // m) * m


def _round_down(n, m):
    return (n // m) * m


def _mlp_kernel(x_ref, w1_ref, b1_ref, w2_ref, b2_ref, w3_ref, b3_ref, o_ref):
    x = x_ref[...]                                                   # (TB, D), f32 or bf16
    # fc1: (50, D) . (TB, D)^T -> (50, TB); MXU matmul with transposed-rhs latch,
    # f32 accumulation (same contraction pattern as flash-attention's q @ k.T).
    h1 = lax.dot_general(w1_ref[...], x, (((1,), (1,)), ((), ())),
                         preferred_element_type=jnp.float32)
    h1 = jnp.maximum(h1 + b1_ref[...], 0.0)                          # bias column bcast over lanes
    # fc2: (20, 50) . (50, TB) -> (20, TB)
    h2 = jnp.dot(w2_ref[...], h1, preferred_element_type=jnp.float32)
    h2 = jnp.maximum(h2 + b2_ref[...], 0.0)
    # fc3 (out_features == 1): VPU multiply + sublane (XLU) reduce -> lane-dense (1, TB).
    y = jnp.sum(h2 * w3_ref[...], axis=0, keepdims=True) + b3_ref[...]
    o_ref[...] = y.astype(o_ref.dtype)


def _pick_tile(B, D, x_itemsize):
    """Pick a batch tile from a VMEM streaming budget (per-row bytes are D-aware)."""
    per_row = (2 * _round_up(D, 128) * x_itemsize   # x double buffer (lane dim pads to 128)
               + 4 * (56 + 24)                      # h1 (50->56 sublanes) + h2 (20->24), f32
               + 4 * 56                             # margin for pre-ReLU temporaries
               + 4 * 8 * 2)                         # (1, tb) f32 output double buffer
    budget = 20 << 20                               # portable across v5e / v6e / v7x (64 MiB/TC)
    tb = _round_down(budget // per_row, 128)
    tb = max(128, min(tb, 16384))                   # amortize ~0.35us/step; avoid silly-huge tiles
    tb = min(tb, _round_up(B, 128))                 # never larger than the batch needs
    # v7x megacore: guarantee >= 2 grid tiles so ("parallel",) can use both TensorCores.
    if B > 128 and -(-B // tb) < 2:
        tb = _round_up(-(-B // 2), 128)
    return tb, per_row


def regression_model_forward(x, params, *, tile_batch=None):
    """x: (B, input_size), f32 or bf16.  params: PyTorch layout w{1,2,3}:(out,in), b{1,2,3}:(out,)."""
    B, D = x.shape
    w1 = params["w1"]
    if x.dtype != jnp.float32:
        w1 = w1.astype(x.dtype)       # tiny cast; lets fc1 run on the bf16 MXU path (f32 accum)
    b1 = params["b1"].reshape(-1, 1).astype(jnp.float32)   # (50, 1)
    w2 = params["w2"].astype(jnp.float32)                  # (20, 50)
    b2 = params["b2"].reshape(-1, 1).astype(jnp.float32)   # (20, 1)
    w3 = params["w3"].reshape(-1, 1).astype(jnp.float32)   # (20, 1)
    b3 = params["b3"].reshape(1, 1).astype(jnp.float32)    # (1, 1)

    auto_tb, per_row = _pick_tile(B, D, x.dtype.itemsize)
    tb = auto_tb if tile_batch is None else max(128, _round_up(tile_batch, 128))
    nt = pl.cdiv(B, tb)

    weights_bytes = sum(int(a.size) * a.dtype.itemsize for a in (w1, b1, w2, b2, w3, b3))
    need = tb * per_row + 2 * weights_bytes + (8 << 20)
    vmem_limit = int(min(48 << 20, max(24 << 20, need)))   # > v5e's 16 MiB default, < v7x's 64 MiB/TC

    h1n, h2n = w1.shape[0], w2.shape[0]
    cost = pl.CostEstimate(
        flops=2 * B * (D * h1n + h1n * h2n + h2n),
        transcendentals=0,
        bytes_accessed=x.dtype.itemsize * B * D + 4 * B + weights_bytes,
    )

    const_spec = lambda a: pl.BlockSpec(a.shape, lambda i: (0,) * a.ndim)

    out = pl.pallas_call(
        _mlp_kernel,
        out_shape=jax.ShapeDtypeStruct((1, nt * tb), jnp.float32),
        grid=(nt,),
        in_specs=[
            # Streamed batch tile of x; last block is a Pallas edge-masked partial block
            # (no wrapper-side padding pass over x in HBM).
            pl.BlockSpec((tb, D), lambda i: (i, 0)),
            const_spec(w1), const_spec(b1),           # weights stay VMEM-resident
            const_spec(w2), const_spec(b2),
            const_spec(w3), const_spec(b3),
        ],
        out_specs=pl.BlockSpec((1, tb), lambda i: (0, i)),   # lane-dense output block
        compiler_params=pltpu.CompilerParams(
            dimension_semantics=("parallel",),        # v7x: shard batch tiles over both TCs
            vmem_limit_bytes=vmem_limit,
        ),
        cost_estimate=cost,
    )(x, w1, b1, w2, b2, w3, b3)

    # Padded tail columns (from the edge-masked last tile) are sliced off here and
    # must never be read by anything downstream.
    return out[0, :B].reshape(B, 1)


def init_params(key, input_size):
    """PyTorch nn.Linear default init: U(-1/sqrt(fan_in), +1/sqrt(fan_in)); W:(out,in), b:(out,)."""
    def linear(k, fan_in, fan_out):
        kw, kb = jax.random.split(k)
        bound = 1.0 / (fan_in ** 0.5)
        w = jax.random.uniform(kw, (fan_out, fan_in), jnp.float32, -bound, bound)
        b = jax.random.uniform(kb, (fan_out,), jnp.float32, -bound, bound)
        return w, b

    k1, k2, k3 = jax.random.split(key, 3)
    w1, b1 = linear(k1, input_size, 50)
    w2, b2 = linear(k2, 50, 20)
    w3, b3 = linear(k3, 20, 1)
    return {"w1": w1, "b1": b1, "w2": w2, "b2": b2, "w3": w3, "b3": b3}


def reference_forward(x, p):
    h1 = jnp.maximum(x @ p["w1"].T + p["b1"], 0.0)
    h2 = jnp.maximum(h1 @ p["w2"].T + p["b2"], 0.0)
    return h2 @ p["w3"].T + p["b3"]


if __name__ == "__main__":
    key = jax.random.PRNGKey(0)
    kx, kp, kx2, kx3 = jax.random.split(key, 4)

    input_size = 32
    params = init_params(kp, input_size)

    # Small demo batch, shaped like the PyTorch module expects: (batch, input_size).
    x = jax.random.normal(kx, (8, input_size), jnp.float32)
    out = jax.block_until_ready(regression_model_forward(x, params))
    ref = reference_forward(x, params)
    assert out.shape == (8, 1), out.shape
    assert jnp.allclose(out, ref, atol=1e-4, rtol=1e-4), "mismatch vs reference (B=8)"

    # Multi-tile grid + edge-masked partial last block (200 = 128 + 72), no padding pass.
    x2 = jax.random.normal(kx2, (200, input_size), jnp.float32)
    out2 = jax.block_until_ready(regression_model_forward(x2, params, tile_batch=128))
    ref2 = reference_forward(x2, params)
    assert out2.shape == (200, 1), out2.shape
    assert jnp.allclose(out2, ref2, atol=1e-4, rtol=1e-4), "mismatch vs reference (B=200)"

    # bf16 activation streaming path (half the x HBM bytes; f32 accumulation on the MXU).
    x3 = jax.random.normal(kx3, (256, input_size), jnp.float32).astype(jnp.bfloat16)
    out3 = jax.block_until_ready(regression_model_forward(x3, params))
    params_bf16_fc1 = dict(params, w1=params["w1"].astype(jnp.bfloat16).astype(jnp.float32))
    ref3 = reference_forward(x3.astype(jnp.float32), params_bf16_fc1)
    assert out3.shape == (256, 1), out3.shape
    assert jnp.allclose(out3, ref3, atol=2e-2, rtol=2e-2), "mismatch vs reference (bf16 B=256)"

    print("KERNEL_OK")
</pallas_src>

<mosaic_0001>
module attributes {stable_mosaic.version = 11 : i64} {
  func.func @_mlp_kernel(%arg0: i32, %arg1: memref<128x32xf32, #tpu.memory_space<vmem>>, %arg2: memref<50x32xf32, #tpu.memory_space<vmem>>, %arg3: memref<50x1xf32, #tpu.memory_space<vmem>>, %arg4: memref<20x50xf32, #tpu.memory_space<vmem>>, %arg5: memref<20x1xf32, #tpu.memory_space<vmem>>, %arg6: memref<20x1xf32, #tpu.memory_space<vmem>>, %arg7: memref<1x1xf32, #tpu.memory_space<vmem>>, %arg8: memref<1x128xf32, #tpu.memory_space<vmem>>) attributes {dimension_semantics = [#tpu.dimension_semantics<parallel>], iteration_bounds = array<i64: 1>, scalar_prefetch = 0 : i64, scratch_operands = 0 : i64, tpu.core_type = #tpu.core_type<tc>, window_params = [{transform_indices = @transform_0, window_bounds = array<i64: 128, 32>}, {pipeline_mode = #tpu.pipeline_mode<synchronous>, transform_indices = @transform_1, window_bounds = array<i64: 50, 32>}, {pipeline_mode = #tpu.pipeline_mode<synchronous>, transform_indices = @transform_2, window_bounds = array<i64: 50, 1>}, {pipeline_mode = #tpu.pipeline_mode<synchronous>, transform_indices = @transform_3, window_bounds = array<i64: 20, 50>}, {pipeline_mode = #tpu.pipeline_mode<synchronous>, transform_indices = @transform_4, window_bounds = array<i64: 20, 1>}, {pipeline_mode = #tpu.pipeline_mode<synchronous>, transform_indices = @transform_5, window_bounds = array<i64: 20, 1>}, {pipeline_mode = #tpu.pipeline_mode<synchronous>, transform_indices = @transform_6, window_bounds = array<i64: 1, 1>}, {transform_indices = @transform_7, window_bounds = array<i64: 1, 128>}]} {
    %c0 = arith.constant 0 : index
    %c0_0 = arith.constant 0 : index
    %0 = vector.load %arg1[%c0, %c0_0] : memref<128x32xf32, #tpu.memory_space<vmem>>, vector<128x32xf32>
    %c0_1 = arith.constant 0 : index
    %c0_2 = arith.constant 0 : index
    %1 = vector.load %arg2[%c0_1, %c0_2] : memref<50x32xf32, #tpu.memory_space<vmem>>, vector<50x32xf32>
    %cst = arith.constant dense<0.000000e+00> : vector<50x128xf32>
    %2 = tpu.matmul %1, %0, %cst {dimension_numbers = #tpu.dot_dimension_numbers<[1], [1], [0], [0], [0, 0, 1, 0], [], []>} : vector<50x32xf32>, vector<128x32xf32>, vector<50x128xf32> -> vector<50x128xf32>
    %c0_3 = arith.constant 0 : index
    %c0_4 = arith.constant 0 : index
    %3 = vector.load %arg3[%c0_3, %c0_4] : memref<50x1xf32, #tpu.memory_space<vmem>>, vector<50x1xf32>
    %4 = vector.broadcast %3 : vector<50x1xf32> to vector<50x128xf32>
    %5 = arith.addf %2, %4 : vector<50x128xf32>
    %cst_5 = arith.constant 0.000000e+00 : f32
    %6 = vector.broadcast %cst_5 : f32 to vector<50x128xf32>
    %7 = arith.maximumf %5, %6 : vector<50x128xf32>
    %c0_6 = arith.constant 0 : index
    %c0_7 = arith.constant 0 : index
    %8 = vector.load %arg4[%c0_6, %c0_7] : memref<20x50xf32, #tpu.memory_space<vmem>>, vector<20x50xf32>
    %cst_8 = arith.constant dense<0.000000e+00> : vector<20x128xf32>
    %9 = tpu.matmul %8, %7, %cst_8 {dimension_numbers = #tpu.dot_dimension_numbers<[1], [0], [0], [1], [0, 0, 1, 1], [], []>} : vector<20x50xf32>, vector<50x128xf32>, vector<20x128xf32> -> vector<20x128xf32>
    %c0_9 = arith.constant 0 : index
    %c0_10 = arith.constant 0 : index
    %10 = vector.load %arg5[%c0_9, %c0_10] : memref<20x1xf32, #tpu.memory_space<vmem>>, vector<20x1xf32>
    %11 = vector.broadcast %10 : vector<20x1xf32> to vector<20x128xf32>
    %12 = arith.addf %9, %11 : vector<20x128xf32>
    %cst_11 = arith.constant 0.000000e+00 : f32
    %13 = vector.broadcast %cst_11 : f32 to vector<20x128xf32>
    %14 = arith.maximumf %12, %13 : vector<20x128xf32>
    %c0_12 = arith.constant 0 : index
    %c0_13 = arith.constant 0 : index
    %15 = vector.load %arg6[%c0_12, %c0_13] : memref<20x1xf32, #tpu.memory_space<vmem>>, vector<20x1xf32>
    %16 = vector.broadcast %15 : vector<20x1xf32> to vector<20x128xf32>
    %17 = arith.mulf %14, %16 : vector<20x128xf32>
    %cst_14 = arith.constant dense<0.000000e+00> : vector<128xf32>
    %18 = vector.multi_reduction <add>, %17, %cst_14 [0] : vector<20x128xf32> to vector<128xf32>
    %19 = vector.shape_cast %18 : vector<128xf32> to vector<1x128xf32>
    %c0_15 = arith.constant 0 : index
    %c0_16 = arith.constant 0 : index
    %20 = vector.load %arg7[%c0_15, %c0_16] : memref<1x1xf32, #tpu.memory_space<vmem>>, vector<1x1xf32>
    %21 = vector.broadcast %20 : vector<1x1xf32> to vector<1x128xf32>
    %22 = arith.addf %19, %21 : vector<1x128xf32>
    %c0_17 = arith.constant 0 : index
    %c0_18 = arith.constant 0 : index
    %23 = vector.load %arg8[%c0_17, %c0_18] : memref<1x128xf32, #tpu.memory_space<vmem>>, vector<1x128xf32>
    tpu.vector_store %arg8[%c0_17, %c0_18], %22 {strides = array<i32>} : memref<1x128xf32, #tpu.memory_space<vmem>>, vector<1x128xf32>,
    return
  }
  func.func @transform_0(%arg0: i32) -> (i32, i32) {
    %c0_i32 = arith.constant 0 : i32
    %c0_i32_0 = arith.constant 0 : i32
    return %arg0, %c0_i32 : i32, i32
  }
  func.func @transform_1(%arg0: i32) -> (i32, i32) {
    %c0_i32 = arith.constant 0 : i32
    %c0_i32_0 = arith.constant 0 : i32
    %c0_i32_1 = arith.constant 0 : i32
    return %c0_i32, %c0_i32_0 : i32, i32
  }
  func.func @transform_2(%arg0: i32) -> (i32, i32) {
    %c0_i32 = arith.constant 0 : i32
    %c0_i32_0 = arith.constant 0 : i32
    %c0_i32_1 = arith.constant 0 : i32
    return %c0_i32, %c0_i32_0 : i32, i32
  }
  func.func @transform_3(%arg0: i32) -> (i32, i32) {
    %c0_i32 = arith.constant 0 : i32
    %c0_i32_0 = arith.constant 0 : i32
    %c0_i32_1 = arith.constant 0 : i32
    return %c0_i32, %c0_i32_0 : i32, i32
  }
  func.func @transform_4(%arg0: i32) -> (i32, i32) {
    %c0_i32 = arith.constant 0 : i32
    %c0_i32_0 = arith.constant 0 : i32
    %c0_i32_1 = arith.constant 0 : i32
    return %c0_i32, %c0_i32_0 : i32, i32
  }
  func.func @transform_5(%arg0: i32) -> (i32, i32) {
    %c0_i32 = arith.constant 0 : i32
    %c0_i32_0 = arith.constant 0 : i32
    %c0_i32_1 = arith.constant 0 : i32
    return %c0_i32, %c0_i32_0 : i32, i32
  }
  func.func @transform_6(%arg0: i32) -> (i32, i32) {
    %c0_i32 = arith.constant 0 : i32
    %c0_i32_0 = arith.constant 0 : i32
    %c0_i32_1 = arith.constant 0 : i32
    return %c0_i32, %c0_i32_0 : i32, i32
  }
  func.func @transform_7(%arg0: i32) -> (i32, i32) {
    %c0_i32 = arith.constant 0 : i32
    %c0_i32_0 = arith.constant 0 : i32
    return %c0_i32, %arg0 : i32, i32
  }
}

</mosaic_0001>

<bundles_post_ra>
// kernel: tpu_custom_call.1
= control target key start
LH: loop header
LB: loop body
LE: loop exit
PB: predicated region body
PF: predicated region fallthrough
CT: control target
= control target key end

     0   :  { %s843_s0 = inlined_call_operand.vmem [shape: f32[8,32], index: 0, kind: input, shape index: {}]   ;;  %s844_s1 = inlined_call_operand.vmem [shape: f32[50,32], index: 1, kind: input, shape index: {}]   ;;  %s845_s2 = inlined_call_operand.vmem [shape: f32[50,1], index: 2, kind: input, shape index: {}]   ;;  %s846_s3 = inlined_call_operand.vmem [shape: f32[20,50], index: 3, kind: input, shape index: {}]   ;;  %s847_s4 = inlined_call_operand.vmem [shape: f32[20,1], index: 4, kind: input, shape index: {}]   ;;  %s848_s5 = inlined_call_operand.vmem [shape: f32[20,1], index: 5, kind: input, shape index: {}]   ;;  %s849_s6 = inlined_call_operand.<no memory space> [shape: f32[1,1], index: 6, kind: input, shape index: {}]   ;;  %s850_s7 = inlined_call_operand.hbm [shape: f32[1,128], index: 7, kind: output, shape index: {}]  }
   0x1   :  { %v12_v0 = vstv %s849_s6 }
   0x2   :  { %13 = vst [vmem:[#allocation2] sm:$0x1] %v12_v0 }
   0x3   :  { %v44_v1 = vld [vmem:[%s843_s0 + $0x78] sm:$0xff]  ;;  %vm94_vm0 = vcmask 261120   ;;  %v610_v2 = vmov 0.0   ;;  %vm611_vm1 = vmmov 0   ;;  %v612_v3 = vmov 0   ;;  %v43_v4 = vld [vmem:[%s843_s0 + $0x70] sm:$0xff] }
   0x4   :  { %506 = vmatprep.subr.mxu0 %v610_v2  ;;  %538 = vmatprep.mubr.msk.f32.mxu0 %vm611_vm1, %v610_v2  ;;  %v42_v5 = vld [vmem:[%s843_s0 + $0x68] sm:$0xff]  ;;  %v58_v6 = vld [vmem:[%s845_s2 + $0x30] sm:$0x3]  ;;  %v56_v7 = vld [vmem:[%s845_s2 + $0x20] sm:$0xff] }
   0x5   :  { %507 = vmatpush3.xpose.msk.msra.mxu0 %vm94_vm0, %v44_v1  ;;  %586 = vset.pattern.permute.xlu0 %v612_v3  ;;  %v57_v8 = vld [vmem:[%s845_s2 + $0x28] sm:$0xff]  ;;  %v55_v9 = vld [vmem:[%s845_s2 + $0x18] sm:$0xff]  ;;  %v41_v10 = vld [vmem:[%s843_s0 + $0x60] sm:$0xff] }
   0x6   :  { %508 = vmatprep.subr.mxu0 %v610_v2  ;;  %587 = vset.pattern.permute.xlu1 %v612_v3 }
   0x7   :  { %559 = vmatprep.subr.mxu1 %v610_v2  ;;  %573 = vmatprep.mubr.msk.f32.mxu1 %vm611_vm1, %v610_v2 }
   0x8   :  { %91 = vperm.xlu0 %586, %v58_v6   ;;  %81 = vperm.xlu1 %587, %v56_v7  }
   0x9   :  { %509 = vmatpush3.xpose.msk.msra.mxu0 %vm94_vm0, %v43_v4 }
   0xa   :  { %510 = vmatprep.subr.mxu0 %v610_v2 }
   0xc   :  { %86 = vperm.xlu0 %586, %v57_v8  }
   0xd   :  { %511 = vmatpush3.xpose.msk.msra.mxu0 %vm94_vm0, %v42_v5 }
   0xe   :  { %512 = vmatprep.subr.mxu0 %v610_v2 }
   0xf   :  { %14 = vsyncpa [#allocation4], 0  ;;  %v54_v11 = vld [vmem:[%s845_s2 + $0x10] sm:$0xff]  ;;  %76 = vperm.xlu1 %587, %v55_v9   ;;  %v53_v12 = vld [vmem:[%s845_s2 + $0x8] sm:$0xff]  ;;  %vm302_vm2 = vcmask 1041408   ;;  %vm292_vm3 = vcmask 408576  }
  0x10   :  { %v40_v13 = vld [vmem:[%s843_s0 + $0x58] sm:$0xff]  ;;  %71 = vperm.xlu0 %586, %v54_v11   ;;  %v52_v14 = vld [vmem:[%s845_s2] sm:$0xff]  ;;  %v39_v16 = vld [vmem:[%s843_s0 + $0x50] sm:$0xff]  ;;  %vm411_vm4 = vcmask 1043456  }
  0x11   :  { %513 = vmatpush3.xpose.msk.msra.mxu0 %vm94_vm0, %v41_v10  ;;  %v274_v15 = vld [vmem:[%s847_s4] sm:$0xff]  ;;  %v275_v17 = vld [vmem:[%s847_s4 + $0x8] sm:$0xff]  ;;  %v276_v18 = vld [vmem:[%s847_s4 + $0x10] sm:$0xf] }
  0x12   :  { %514 = vmatprep.subr.mxu0 %v610_v2  ;;  %v38_v19 = vld [vmem:[%s843_s0 + $0x48] sm:$0xff]  ;;  %v389_v20 = vld [vmem:[%s848_s5] sm:$0xff]  ;;  %v391_v23 = vld [vmem:[%s848_s5 + $0x10] sm:$0xf] }
  0x13   :  { %66 = vperm.xlu1 %587, %v53_v12   ;;  %v390_v21 = vld [vmem:[%s848_s5 + $0x8] sm:$0xff]  ;;  %v37_v22 = vld [vmem:[%s843_s0 + $0x40] sm:$0xff]  ;;  %v36_v25 = vld [vmem:[%s843_s0 + $0x38] sm:$0xff] }
  0x14   :  { %61 = vperm.xlu0 %586, %v52_v14   ;;  %v420_v24 = vld [vmem:[#allocation2] sm:$0x1]  ;;  %v35_v26 = vld [vmem:[%s843_s0 + $0x30] sm:$0xff]  ;;  %v34_v27 = vld [vmem:[%s843_s0 + $0x28] sm:$0xff] }
  0x15   :  { %515 = vmatpush3.xpose.msk.msra.mxu0 %vm94_vm0, %v40_v13  ;;  %v33_v28 = vld [vmem:[%s843_s0 + $0x20] sm:$0xff]  ;;  %v32_v29 = vld [vmem:[%s843_s0 + $0x18] sm:$0xff]  ;;  %v31_v30 = vld [vmem:[%s843_s0 + $0x10] sm:$0xff] }
  0x16   :  { %516 = vmatprep.subr.mxu0 %v610_v2  ;;  %v30_v31 = vld [vmem:[%s843_s0 + $0x8] sm:$0xff]  ;;  %v29_v32 = vld [vmem:[%s843_s0] sm:$0xff]  ;;  %v47_v35 = vld [vmem:[%s844_s1 + $0x10] sm:$0xff] }
  0x17   :  { %279 = vperm.xlu1 %587, %v274_v15   ;;  %v45_v33 = vld [vmem:[%s844_s1] sm:$0xff]  ;;  %v46_v34 = vld [vmem:[%s844_s1 + $0x8] sm:$0xff]  ;;  %v48_v36 = vld [vmem:[%s844_s1 + $0x18] sm:$0xff] }
  0x18   :  { %284 = vperm.xlu0 %586, %v275_v17   ;;  %v49_v37 = vld [vmem:[%s844_s1 + $0x20] sm:$0xff]  ;;  %v50_v38 = vld [vmem:[%s844_s1 + $0x28] sm:$0xff]  ;;  %v51_v39 = vld [vmem:[%s844_s1 + $0x30] sm:$0x3] }
  0x19   :  { %517 = vmatpush3.xpose.msk.msra.mxu0 %vm94_vm0, %v39_v16  ;;  %v271_v12 = vld [vmem:[%s846_s3] sm:$0xff]  ;;  %v272_v13 = vld [vmem:[%s846_s3 + $0x8] sm:$0xff]  ;;  %v273_v14 = vld [vmem:[%s846_s3 + $0x10] sm:$0xf]  ;;  %s613_s3 = smov [#allocation3]  }
  0x1a   :  { %518 = vmatprep.subr.mxu0 %v610_v2  ;;  %s438_s24 = sshll.u32 %s613_s3, 4  ;;  %s439_s24 = int_to_ptr.vmem [resolvable:$true] %s438_s24 }
  0x1b   :  { %289 = vperm.xlu1 %587, %v276_v18   ;;  %s588_s25 = scalar_lea.vmem %s439_s24, 16  ;;  %s592_s26 = scalar_lea.vmem %s439_s24, 32 }
  0x1c   :  { %394 = vperm.xlu0 %586, %v389_v20   ;;  %p589_p0 = scmp.ne.s32.totalorder %s439_s24, %s588_s25  ;;  %p593_p1 = scmp.lt.s32.totalorder %s439_s24, %s439_s24 }
  0x1d   :  { %519 = vmatpush3.xpose.msk.msra.mxu0 %vm94_vm0, %v38_v19  ;;  %p594_p2 = scmp.lt.s32.totalorder %s592_s26, %s588_s25 }
  0x1e   :  { %520 = vmatprep.subr.mxu0 %v610_v2 }
  0x1f   :  { %399 = vperm.xlu1 %587, %v390_v21   ;;  %p595_p3 = por %p594_p2, %p593_p1 }
  0x20   :  { %404 = vperm.xlu0 %586, %v391_v23  }
  0x21   :  { %521 = vmatpush3.xpose.msk.msra.mxu0 %vm94_vm0, %v37_v22  ;;  %p596_p4 = pnand %p595_p3, %p589_p0 }
  0x22   :  { %522 = vmatprep.subr.mxu0 %v610_v2 }
  0x23   :  { %423 = vperm.xlu1 %587, %v420_v24  }
  0x25   :  { %523 = vmatpush3.xpose.msk.msra.mxu0 %vm94_vm0, %v36_v25 }
  0x26   :  { %524 = vmatprep.subr.mxu0 %v610_v2 }
  0x29   :  { %525 = vmatpush3.xpose.msk.msra.mxu0 %vm94_vm0, %v35_v26 }
  0x2a   :  { %526 = vmatprep.subr.mxu0 %v610_v2 }
  0x2d   :  { %527 = vmatpush3.xpose.msk.msra.mxu0 %vm94_vm0, %v34_v27 }
  0x2e   :  { %528 = vmatprep.subr.mxu0 %v610_v2 }
  0x31   :  { %529 = vmatpush3.xpose.msk.msra.mxu0 %vm94_vm0, %v33_v28 }
  0x32   :  { %530 = vmatprep.subr.mxu0 %v610_v2 }
  0x35   :  { %531 = vmatpush3.xpose.msk.msra.mxu0 %vm94_vm0, %v32_v29 }
  0x36   :  { %532 = vmatprep.subr.mxu0 %v610_v2 }
  0x39   :  { %533 = vmatpush3.xpose.msk.msra.mxu0 %vm94_vm0, %v31_v30 }
  0x3a   :  { %534 = vmatprep.subr.mxu0 %v610_v2 }
  0x3d   :  { %535 = vmatpush3.xpose.msk.msra.mxu0 %vm94_vm0, %v30_v31 }
  0x3e   :  { %536 = vmatprep.subr.mxu0 %v610_v2 }
  0x41   :  { %537 = vmatpush3.xpose.msk.msra.mxu0 %vm94_vm0, %v29_v32 }
  0x44   :  { %539 = vmatmul.mubr.msk.f32.vlgmr.msra.gmra.mxu0 %vm94_vm0, %v45_v33 }
  0x45   :  { %541 = vmatprep.mubr.msk.f32.mxu0 %vm611_vm1, %v610_v2 }
  0x48   :  { %542 = vmatmul.mubr.msk.f32.gmra.mxu0 %vm94_vm0, %v46_v34 }
  0x49   :  { %544 = vmatprep.mubr.msk.f32.mxu0 %vm611_vm1, %v610_v2 }
  0x4c   :  { %545 = vmatmul.mubr.msk.f32.gmra.mxu0 %vm94_vm0, %v47_v35 }
  0x4d   :  { %547 = vmatprep.mubr.msk.f32.mxu0 %vm611_vm1, %v610_v2 }
  0x50   :  { %548 = vmatmul.mubr.msk.f32.gmra.mxu0 %vm94_vm0, %v48_v36 }
  0x51   :  { %550 = vmatprep.mubr.msk.f32.mxu0 %vm611_vm1, %v610_v2 }
  0x54   :  { %551 = vmatmul.mubr.msk.f32.gmra.mxu0 %vm94_vm0, %v49_v37  ;;  %v426_v37 = vlaneseq }
  0x55   :  { %553 = vmatprep.mubr.msk.f32.mxu0 %vm611_vm1, %v610_v2 }
  0x58   :  { %554 = vmatmul.mubr.msk.f32.gmra.mxu0 %vm94_vm0, %v50_v38 }
  0x59   :  { %556 = vmatprep.mubr.msk.f32.mxu0 %vm611_vm1, %v610_v2 }
  0x5c   :  { %557 = vmatmul.mubr.msk.f32.gmra.mxu0 %vm94_vm0, %v51_v39 }
  0x83   :  { %v92_v47 = vpop.permute.xlu0 %91  ;;  %v82_v50 = vpop.permute.xlu1 %81 }
  0x87   :  { %v87_v52 = vpop.permute.xlu0 %86 }
  0x8a   :  { %v77_v55 = vpop.permute.xlu1 %76 }
  0x8b   :  { %v72_v59 = vpop.permute.xlu0 %71 }
  0x8e   :  { %v67_v1 = vpop.permute.xlu1 %66 }
  0x8f   :  { %v62_v5 = vpop.permute.xlu0 %61 }
  0x92   :  { %v280_v15 = vpop.permute.xlu1 %279 }
  0x93   :  { %v285_v16 = vpop.permute.xlu0 %284 }
  0x96   :  { %v290_v19 = vpop.permute.xlu1 %289 }
  0x97   :  { %v395_v23 = vpop.permute.xlu0 %394 }
  0x9a   :  { %v400_v28 = vpop.permute.xlu1 %399 }
  0x9b   :  { %v405_v32 = vpop.permute.xlu0 %404 }
 0x104   :  { %v230_v40 = vpop.f32.mrf.mxu0 }
 0x105   :  { %v231_v8 = vadd.f32 %v230_v40, %v62_v5  ;;  %v427_v40 = vshrl.u32 %v426_v37, 7 }
 0x106   :  { %v540_v41 = vpop.f32.mrf.mxu0 }
 0x107   :  { %v264_v11 = vmax.f32 %v231_v8, 0.0 }
 0x108   :  { %v235_v42 = vpop.f32.mrf.mxu0 }
 0x109   :  { %v236_v6 = vadd.f32 %v235_v42, %v67_v1 }
 0x10a   :  { %v543_v43 = vpop.f32.mrf.mxu0 }
 0x10b   :  { %v265_v10 = vmax.f32 %v236_v6, 0.0  ;;  %v428_v43 = vsub.s32 0, %v427_v40 }
 0x10c   :  { %v240_v44 = vpop.f32.mrf.mxu0 }
 0x10d   :  { %v241_v3 = vadd.f32 %v240_v44, %v72_v59 }
 0x10e   :  { %v546_v45 = vpop.f32.mrf.mxu0 }
 0x10f   :  { %v266_v9 = vmax.f32 %v241_v3, 0.0  ;;  %v424_v45 = vpop.permute.xlu1 %423 }
 0x110   :  { %v245_v46 = vpop.f32.mrf.mxu0 }
 0x111   :  { %v246_v63 = vadd.f32 %v245_v46, %v77_v55 }
 0x112   :  { %v549_v48 = vpop.f32.mrf.mxu0 }
 0x113   :  { %v267_v7 = vmax.f32 %v246_v63, 0.0 }
 0x114   :  { %v250_v49 = vpop.f32.mrf.mxu0 }
 0x115   :  { %v251_v61 = vadd.f32 %v250_v49, %v82_v50 }
 0x116   :  { %v552_v51 = vpop.f32.mrf.mxu0 }
 0x117   :  { %v268_v4 = vmax.f32 %v251_v61, 0.0 }
 0x118   :  { %v255_v53 = vpop.f32.mrf.mxu0 }
 0x119   :  { %v256_v57 = vadd.f32 %v255_v53, %v87_v52 }
 0x11a   :  { %v555_v54 = vpop.f32.mrf.mxu0 }
 0x11b   :  { %v269_v0 = vmax.f32 %v256_v57, 0.0 }
 0x11c   :  { %v260_v56 = vpop.f32.mrf.mxu0 }
 0x11d   :  { %v261_v58 = vadd.f32 %v260_v56, %v92_v47  ;;  %v429_v47 = vrot.slane %v424_v45, %v428_v43 }
 0x11e   :  { %v558_v60 = vpop.f32.mrf.mxu0 }
 0x11f   :  { %v270_v62 = vmax.f32 %v261_v58, 0.0 }
 0x121   :  { %560 = vmatpush3.msk.msra.mxu1 %vm302_vm2, %v270_v62 }
 0x122   :  { %561 = vmatprep.subr.mxu1 %v610_v2 }
 0x123   :  { %562 = vmatpush3.msra.mxu1 %v269_v0 }
 0x124   :  { %563 = vmatprep.subr.mxu1 %v610_v2 }
 0x125   :  { %564 = vmatpush3.msra.mxu1 %v268_v4 }
 0x126   :  { %565 = vmatprep.subr.mxu1 %v610_v2 }
 0x127   :  { %566 = vmatpush3.msra.mxu1 %v267_v7 }
 0x128   :  { %567 = vmatprep.subr.mxu1 %v610_v2 }
 0x129   :  { %568 = vmatpush3.msra.mxu1 %v266_v9 }
 0x12a   :  { %569 = vmatprep.subr.mxu1 %v610_v2 }
 0x12b   :  { %570 = vmatpush3.msra.mxu1 %v265_v10 }
 0x12c   :  { %571 = vmatprep.subr.mxu1 %v610_v2 }
 0x12d   :  { %572 = vmatpush3.msra.mxu1 %v264_v11 }
 0x12e   :  { %574 = vmatmul.mubr.msk.f32.vlgmr.msra.gmra.mxu1 %vm292_vm3, %v271_v12 }
 0x12f   :  { %576 = vmatprep.mubr.msk.f32.mxu1 %vm611_vm1, %v610_v2 }
 0x132   :  { %577 = vmatmul.mubr.msk.f32.gmra.mxu1 %vm292_vm3, %v272_v13 }
 0x133   :  { %579 = vmatprep.mubr.msk.f32.mxu1 %vm611_vm1, %v610_v2 }
 0x136   :  { %580 = vmatmul.mubr.msk.f32.gmra.mxu1 %vm292_vm3, %v273_v14 }
 0x1ee   :  { %v372_v17 = vpop.f32.mrf.mxu1 }
 0x1ef   :  { %v373_v20 = vadd.f32 %v372_v17, %v280_v15 }
 0x1f0   :  { %v575_v18 = vpop.f32.mrf.mxu1 }
 0x1f1   :  { %v386_v26 = vmax.f32 %v373_v20, 0.0 }
 0x1f2   :  { %v377_v21 = vpop.f32.mrf.mxu1 }
 0x1f3   :  { %v378_v22 = vadd.f32 %v377_v21, %v285_v16  ;;  %v407_v33 = vmul.f32 %v395_v23, %v386_v26 }
 0x1f4   :  { %v578_v24 = vpop.f32.mrf.mxu1 }
 0x1f5   :  { %v387_v25 = vmax.f32 %v378_v22, 0.0 }
 0x1f6   :  { %v382_v27 = vpop.f32.mrf.mxu1 }
 0x1f7   :  { %v383_v2 = vadd.f32 %v382_v27, %v290_v19  ;;  %v408_v29 = vmul.f32 %v400_v28, %v387_v25 }
 0x1f8   :  { %v581_v30 = vpop.f32.mrf.mxu1 }
 0x1f9   :  { %v388_v31 = vmax.f32 %v383_v2, 0.0  ;;  %v410_v35 = vadd.f32 %v408_v29, %v407_v33 }
 0x1fb   :  { %v409_v34 = vmul.f32 %v405_v32, %v388_v31 }
 0x1fd   :  { %v412_v36 = vsel %vm411_vm4, %v409_v34, 0.0 }
 0x1fe   :  { %v413_v38 = vadd.f32 %v412_v36, %v410_v35 }
 0x200   :  { %v414_v39 = vrot.slane %v413_v38, 4 }
 0x202   :  { %v415_v41 = vadd.f32 %v414_v39, %v413_v38 }
 0x204   :  { %v416_v42 = vrot.slane %v415_v41, 2 }
 0x206   :  { %v417_v44 = vadd.f32 %v416_v42, %v415_v41 }
 0x208   :  { %v418_v46 = vrot.slane %v417_v44, 1 }
 0x20a   :  { %v419_v48 = vadd.f32 %v418_v46, %v417_v44 }
 0x20c   :  { %v430_v49 = vadd.f32 %v429_v47, %v419_v48 }
 0x20e   :  { %431 = vst [vmem:[#allocation3] sm:$0x1] %v430_v49 }
 0x20f   :  { %599 = shalt.err (!%p596_p4)
}
 0x210   :  { %441 = dma.vmem_to_hbm [thread:$0]  %s439_s24, 16, %s850_s7, [#allocation4]  }
 0x211   :  { %608 = dma.done.wait [#allocation4], 16  }
 0x212   :  { %609 = vsyncadd [#allocation4], 4294967280 }
 0x213   :  { %445 = vsyncpa [#allocation4], 1 }

</bundles_post_ra>
